<compile_context>
chip_gen: v5e
topology: v5e:2x2
jax: 0.10.0
libtpu: 0.0.40
codegen_flags: <defaults>
</compile_context>

<pallas_src>
import jax
import jax.numpy as jnp
from jax import lax
from jax.experimental import pallas as pl
from jax.experimental.pallas import tpu as pltpu  # noqa: F401  (TPU backend)


def rnn_kernel(x_ref, w_ref, u_ref, b_ref, out_ref):
    # x_ref:   (T*Bp, F)   compute dtype  -- time-major, batch-padded, flattened
    # w_ref:   (F,  Hp)    compute dtype  -- W^T, zero-padded on the lane dim
    # u_ref:   (Hp, Hp)    compute dtype  -- U^T, zero-padded (pad rows/cols are 0)
    # b_ref:   (1,  Hp)    float32        -- bias row (b in first H lanes, else 0)
    # out_ref: (T, Bp, Hp) float32
    T, Bp, Hp = out_ref.shape
    cdt = u_ref.dtype
    # Exact f32 contraction for the (optional) f32 path; bf16 operands already
    # give exact products with f32 accumulation on the default path.
    prec = lax.Precision.HIGHEST if cdt == jnp.float32 else None

    u1 = u_ref[...]                                           # U^T        (Hp, Hp)
    # (U^T)^2 -- independent of the recurrence, off the serial chain.
    u2 = jnp.dot(u1, u1, preferred_element_type=jnp.float32,
                 precision=prec).astype(cdt)                  # (Hp, Hp)

    # Hoisted input projection (+ bias): ONE MXU matmul over every timestep.
    c = jnp.dot(x_ref[...], w_ref[...],
                preferred_element_type=jnp.float32, precision=prec)
    c = c + b_ref[...]                                        # (T*Bp, Hp), f32

    # D = C @ U^T for every timestep: also fully off the serial chain.
    d = jnp.dot(c.astype(cdt), u1,
                preferred_element_type=jnp.float32, precision=prec)

    # --- Serial recurrence, pair-blocked. h_0 = 0 so the first output is C[0].
    # T is static -> the loop fully unrolls with static, tile-aligned offsets.
    h = c[0:Bp]
    out_ref[0] = h
    t = 1
    while t + 1 < T:
        hb = h.astype(cdt)
        h1 = c[t * Bp:(t + 1) * Bp] + jnp.dot(
            hb, u1, preferred_element_type=jnp.float32, precision=prec)
        h2 = (c[(t + 1) * Bp:(t + 2) * Bp] + d[t * Bp:(t + 1) * Bp]
              + jnp.dot(hb, u2, preferred_element_type=jnp.float32, precision=prec))
        out_ref[t] = h1
        out_ref[t + 1] = h2
        h = h2
        t += 2
    if t < T:  # odd tail
        h = c[t * Bp:(t + 1) * Bp] + jnp.dot(
            h.astype(cdt), u1, preferred_element_type=jnp.float32, precision=prec)
        out_ref[t] = h


def my_unidirectional_rnn(x, W, U, b, *, compute_dtype=jnp.bfloat16):
    """Forward pass matching MyUnidirectionalRNN.forward(x, state=None).

    x: (B, T, F)  W: (H, F)  U: (H, H)  b: (1,)   ->   (B, T, H) float32
    compute_dtype: MXU operand dtype (bf16 fast path; float32 for exact module math).
    """
    B, T, F = x.shape
    H = U.shape[0]
    Hp = pl.cdiv(H, 128) * 128      # lane-dense hidden width (128 on v5e/v6e/v7x)
    Bp = pl.cdiv(B, 8) * 8          # sublane-dense batch (8-row tiles)

    # Time-major, batch-padded, flattened to (T*Bp, F) so the kernel's input
    # projection is a single 2-D MXU matmul over all timesteps at once.
    x_tm = jnp.transpose(x, (1, 0, 2))                       # (T, B, F)
    x_tm = jnp.pad(x_tm, ((0, 0), (0, Bp - B), (0, 0)))      # (T, Bp, F)
    x_tm = x_tm.reshape(T * Bp, F).astype(compute_dtype)     # (T*Bp, F)

    # Pre-transposed, zero-padded weights: padded lanes of h stay exactly 0.
    w_p = jnp.zeros((F, Hp), compute_dtype).at[:, :H].set(W.T.astype(compute_dtype))
    u_p = jnp.zeros((Hp, Hp), compute_dtype).at[:H, :H].set(U.T.astype(compute_dtype))
    b_p = jnp.zeros((1, Hp), jnp.float32).at[:, :H].set(b.astype(jnp.float32)[0])

    out_tm = pl.pallas_call(
        rnn_kernel,
        out_shape=jax.ShapeDtypeStruct((T, Bp, Hp), jnp.float32),
        in_specs=[
            pl.BlockSpec((T * Bp, F), lambda: (0, 0)),
            pl.BlockSpec((F, Hp), lambda: (0, 0)),
            pl.BlockSpec((Hp, Hp), lambda: (0, 0)),
            pl.BlockSpec((1, Hp), lambda: (0, 0)),
        ],
        out_specs=pl.BlockSpec((T, Bp, Hp), lambda: (0, 0, 0)),
    )(x_tm, w_p, u_p, b_p)

    # Un-pad and return in the PyTorch (B, T, H) convention.
    return jnp.transpose(out_tm[:, :B, :H], (1, 0, 2))


def _reference(x, W, U, b):
    """Pure-JAX reference reproducing the PyTorch loop in full float32."""
    hi = lax.Precision.HIGHEST
    Wt = W.astype(jnp.float32).T          # (F, H)
    Ut = U.astype(jnp.float32).T          # (H, H)
    bb = b.astype(jnp.float32)

    def step(h, xt):
        h_new = jnp.dot(xt, Wt, precision=hi) + jnp.dot(h, Ut, precision=hi) + bb
        return h_new, h_new

    h0 = jnp.zeros((x.shape[0], U.shape[0]), jnp.float32)
    _, hts = lax.scan(step, h0, jnp.transpose(x.astype(jnp.float32), (1, 0, 2)))
    return jnp.transpose(hts, (1, 0, 2))   # (B, T, H)


if __name__ == "__main__":
    # Shapes implied by the module usage: rnn = MyUnidirectionalRNN(10, 32); x = randn(5, 15, 10)
    B, T, F, H = 5, 15, 10, 32

    key = jax.random.PRNGKey(0)
    kx, kw, ku = jax.random.split(key, 3)

    x = jax.random.normal(kx, (B, T, F), dtype=jnp.float32)
    W = jax.random.normal(kw, (H, F), dtype=jnp.float32) * (1.0 / jnp.sqrt(F))
    U = jax.random.normal(ku, (H, H), dtype=jnp.float32) * (1.0 / jnp.sqrt(H))
    b = jnp.array([0.1], dtype=jnp.float32)   # nn.Parameter(torch.Tensor([0.1]))

    out = my_unidirectional_rnn(x, W, U, b)   # bf16-operand fast path, f32 carry/acc
    out = jax.block_until_ready(out)
    assert out.shape == (B, T, H), out.shape

    # Check against exact f32 module semantics. Tolerances account for bf16
    # operand rounding over a 15-step recurrence (the pair-blocked recurrence
    # reorders, but never increases the number of, bf16 roundings).
    ref = _reference(x, W, U, b)
    rel_norm = jnp.linalg.norm(out - ref) / jnp.linalg.norm(ref)
    rel_max = jnp.max(jnp.abs(out - ref)) / (jnp.max(jnp.abs(ref)) + 1e-6)
    assert rel_norm < 2e-2, f"rel Frobenius error too large: {rel_norm}"
    assert rel_max < 3e-2, f"rel max error too large: {rel_max}"

    print("KERNEL_OK")
</pallas_src>

<mosaic_0001>
module attributes {stable_mosaic.version = 11 : i64} {
  func.func @rnn_kernel(%arg0: memref<120x10xbf16, #tpu.memory_space<vmem>>, %arg1: memref<10x128xbf16, #tpu.memory_space<vmem>>, %arg2: memref<128x128xbf16, #tpu.memory_space<vmem>>, %arg3: memref<1x128xf32, #tpu.memory_space<vmem>>, %arg4: memref<15x8x128xf32, #tpu.memory_space<vmem>>) attributes {dimension_semantics = [], scalar_prefetch = 0 : i64, scratch_operands = 0 : i64, tpu.core_type = #tpu.core_type<tc>} {
    %c0 = arith.constant 0 : index
    %c0_0 = arith.constant 0 : index
    %0 = vector.load %arg2[%c0, %c0_0] : memref<128x128xbf16, #tpu.memory_space<vmem>>, vector<128x128xbf16>
    %cst = arith.constant dense<0.000000e+00> : vector<128x128xf32>
    %1 = tpu.matmul %0, %0, %cst {dimension_numbers = #tpu.dot_dimension_numbers<[1], [0], [0], [1], [0, 0, 1, 1], [], []>} : vector<128x128xbf16>, vector<128x128xbf16>, vector<128x128xf32> -> vector<128x128xf32>
    %2 = arith.truncf %1 : vector<128x128xf32> to vector<128x128xbf16>
    %c0_1 = arith.constant 0 : index
    %c0_2 = arith.constant 0 : index
    %3 = vector.load %arg0[%c0_1, %c0_2] : memref<120x10xbf16, #tpu.memory_space<vmem>>, vector<120x10xbf16>
    %c0_3 = arith.constant 0 : index
    %c0_4 = arith.constant 0 : index
    %4 = vector.load %arg1[%c0_3, %c0_4] : memref<10x128xbf16, #tpu.memory_space<vmem>>, vector<10x128xbf16>
    %cst_5 = arith.constant dense<0.000000e+00> : vector<120x128xf32>
    %5 = tpu.matmul %3, %4, %cst_5 {dimension_numbers = #tpu.dot_dimension_numbers<[1], [0], [0], [1], [0, 0, 1, 1], [], []>} : vector<120x10xbf16>, vector<10x128xbf16>, vector<120x128xf32> -> vector<120x128xf32>
    %c0_6 = arith.constant 0 : index
    %c0_7 = arith.constant 0 : index
    %6 = vector.load %arg3[%c0_6, %c0_7] : memref<1x128xf32, #tpu.memory_space<vmem>>, vector<1x128xf32>
    %7 = vector.broadcast %6 : vector<1x128xf32> to vector<120x128xf32>
    %8 = arith.addf %5, %7 : vector<120x128xf32>
    %9 = arith.truncf %8 : vector<120x128xf32> to vector<120x128xbf16>
    %cst_8 = arith.constant dense<0.000000e+00> : vector<120x128xf32>
    %10 = tpu.matmul %9, %0, %cst_8 {dimension_numbers = #tpu.dot_dimension_numbers<[1], [0], [0], [1], [0, 0, 1, 1], [], []>} : vector<120x128xbf16>, vector<128x128xbf16>, vector<120x128xf32> -> vector<120x128xf32>
    %11 = vector.extract_strided_slice %8 {offsets = [0, 0], sizes = [8, 128], strides = [1, 1]} : vector<120x128xf32> to vector<8x128xf32>
    %c0_9 = arith.constant 0 : index
    %c0_10 = arith.constant 0 : index
    %c0_11 = arith.constant 0 : index
    %12 = vector.load %arg4[%c0_9, %c0_10, %c0_11] : memref<15x8x128xf32, #tpu.memory_space<vmem>>, vector<1x8x128xf32>
    %13 = vector.shape_cast %12 : vector<1x8x128xf32> to vector<8x128xf32>
    %14 = vector.shape_cast %11 : vector<8x128xf32> to vector<1x8x128xf32>
    tpu.vector_store %arg4[%c0_9, %c0_10, %c0_11], %14 {strides = array<i32>} : memref<15x8x128xf32, #tpu.memory_space<vmem>>, vector<1x8x128xf32>,
    %15 = arith.truncf %11 : vector<8x128xf32> to vector<8x128xbf16>
    %16 = vector.extract_strided_slice %8 {offsets = [8, 0], sizes = [8, 128], strides = [1, 1]} : vector<120x128xf32> to vector<8x128xf32>
    %cst_12 = arith.constant dense<0.000000e+00> : vector<8x128xf32>
    %17 = tpu.matmul %15, %0, %cst_12 {dimension_numbers = #tpu.dot_dimension_numbers<[1], [0], [0], [1], [0, 0, 1, 1], [], []>} : vector<8x128xbf16>, vector<128x128xbf16>, vector<8x128xf32> -> vector<8x128xf32>
    %18 = arith.addf %16, %17 : vector<8x128xf32>
    %19 = vector.extract_strided_slice %8 {offsets = [16, 0], sizes = [8, 128], strides = [1, 1]} : vector<120x128xf32> to vector<8x128xf32>
    %20 = vector.extract_strided_slice %10 {offsets = [8, 0], sizes = [8, 128], strides = [1, 1]} : vector<120x128xf32> to vector<8x128xf32>
    %21 = arith.addf %19, %20 : vector<8x128xf32>
    %cst_13 = arith.constant dense<0.000000e+00> : vector<8x128xf32>
    %22 = tpu.matmul %15, %2, %cst_13 {dimension_numbers = #tpu.dot_dimension_numbers<[1], [0], [0], [1], [0, 0, 1, 1], [], []>} : vector<8x128xbf16>, vector<128x128xbf16>, vector<8x128xf32> -> vector<8x128xf32>
    %23 = arith.addf %21, %22 : vector<8x128xf32>
    %c1 = arith.constant 1 : index
    %c0_14 = arith.constant 0 : index
    %c0_15 = arith.constant 0 : index
    %24 = vector.load %arg4[%c1, %c0_14, %c0_15] : memref<15x8x128xf32, #tpu.memory_space<vmem>>, vector<1x8x128xf32>
    %25 = vector.shape_cast %24 : vector<1x8x128xf32> to vector<8x128xf32>
    %26 = vector.shape_cast %18 : vector<8x128xf32> to vector<1x8x128xf32>
    tpu.vector_store %arg4[%c1, %c0_14, %c0_15], %26 {strides = array<i32>} : memref<15x8x128xf32, #tpu.memory_space<vmem>>, vector<1x8x128xf32>,
    %c2 = arith.constant 2 : index
    %c0_16 = arith.constant 0 : index
    %c0_17 = arith.constant 0 : index
    %27 = vector.load %arg4[%c2, %c0_16, %c0_17] : memref<15x8x128xf32, #tpu.memory_space<vmem>>, vector<1x8x128xf32>
    %28 = vector.shape_cast %27 : vector<1x8x128xf32> to vector<8x128xf32>
    %29 = vector.shape_cast %23 : vector<8x128xf32> to vector<1x8x128xf32>
    tpu.vector_store %arg4[%c2, %c0_16, %c0_17], %29 {strides = array<i32>} : memref<15x8x128xf32, #tpu.memory_space<vmem>>, vector<1x8x128xf32>,
    %30 = arith.truncf %23 : vector<8x128xf32> to vector<8x128xbf16>
    %31 = vector.extract_strided_slice %8 {offsets = [24, 0], sizes = [8, 128], strides = [1, 1]} : vector<120x128xf32> to vector<8x128xf32>
    %cst_18 = arith.constant dense<0.000000e+00> : vector<8x128xf32>
    %32 = tpu.matmul %30, %0, %cst_18 {dimension_numbers = #tpu.dot_dimension_numbers<[1], [0], [0], [1], [0, 0, 1, 1], [], []>} : vector<8x128xbf16>, vector<128x128xbf16>, vector<8x128xf32> -> vector<8x128xf32>
    %33 = arith.addf %31, %32 : vector<8x128xf32>
    %34 = vector.extract_strided_slice %8 {offsets = [32, 0], sizes = [8, 128], strides = [1, 1]} : vector<120x128xf32> to vector<8x128xf32>
    %35 = vector.extract_strided_slice %10 {offsets = [24, 0], sizes = [8, 128], strides = [1, 1]} : vector<120x128xf32> to vector<8x128xf32>
    %36 = arith.addf %34, %35 : vector<8x128xf32>
    %cst_19 = arith.constant dense<0.000000e+00> : vector<8x128xf32>
    %37 = tpu.matmul %30, %2, %cst_19 {dimension_numbers = #tpu.dot_dimension_numbers<[1], [0], [0], [1], [0, 0, 1, 1], [], []>} : vector<8x128xbf16>, vector<128x128xbf16>, vector<8x128xf32> -> vector<8x128xf32>
    %38 = arith.addf %36, %37 : vector<8x128xf32>
    %c3 = arith.constant 3 : index
    %c0_20 = arith.constant 0 : index
    %c0_21 = arith.constant 0 : index
    %39 = vector.load %arg4[%c3, %c0_20, %c0_21] : memref<15x8x128xf32, #tpu.memory_space<vmem>>, vector<1x8x128xf32>
    %40 = vector.shape_cast %39 : vector<1x8x128xf32> to vector<8x128xf32>
    %41 = vector.shape_cast %33 : vector<8x128xf32> to vector<1x8x128xf32>
    tpu.vector_store %arg4[%c3, %c0_20, %c0_21], %41 {strides = array<i32>} : memref<15x8x128xf32, #tpu.memory_space<vmem>>, vector<1x8x128xf32>,
    %c4 = arith.constant 4 : index
    %c0_22 = arith.constant 0 : index
    %c0_23 = arith.constant 0 : index
    %42 = vector.load %arg4[%c4, %c0_22, %c0_23] : memref<15x8x128xf32, #tpu.memory_space<vmem>>, vector<1x8x128xf32>
    %43 = vector.shape_cast %42 : vector<1x8x128xf32> to vector<8x128xf32>
    %44 = vector.shape_cast %38 : vector<8x128xf32> to vector<1x8x128xf32>
    tpu.vector_store %arg4[%c4, %c0_22, %c0_23], %44 {strides = array<i32>} : memref<15x8x128xf32, #tpu.memory_space<vmem>>, vector<1x8x128xf32>,
    %45 = arith.truncf %38 : vector<8x128xf32> to vector<8x128xbf16>
    %46 = vector.extract_strided_slice %8 {offsets = [40, 0], sizes = [8, 128], strides = [1, 1]} : vector<120x128xf32> to vector<8x128xf32>
    %cst_24 = arith.constant dense<0.000000e+00> : vector<8x128xf32>
    %47 = tpu.matmul %45, %0, %cst_24 {dimension_numbers = #tpu.dot_dimension_numbers<[1], [0], [0], [1], [0, 0, 1, 1], [], []>} : vector<8x128xbf16>, vector<128x128xbf16>, vector<8x128xf32> -> vector<8x128xf32>
    %48 = arith.addf %46, %47 : vector<8x128xf32>
    %49 = vector.extract_strided_slice %8 {offsets = [48, 0], sizes = [8, 128], strides = [1, 1]} : vector<120x128xf32> to vector<8x128xf32>
    %50 = vector.extract_strided_slice %10 {offsets = [40, 0], sizes = [8, 128], strides = [1, 1]} : vector<120x128xf32> to vector<8x128xf32>
    %51 = arith.addf %49, %50 : vector<8x128xf32>
    %cst_25 = arith.constant dense<0.000000e+00> : vector<8x128xf32>
    %52 = tpu.matmul %45, %2, %cst_25 {dimension_numbers = #tpu.dot_dimension_numbers<[1], [0], [0], [1], [0, 0, 1, 1], [], []>} : vector<8x128xbf16>, vector<128x128xbf16>, vector<8x128xf32> -> vector<8x128xf32>
    %53 = arith.addf %51, %52 : vector<8x128xf32>
    %c5 = arith.constant 5 : index
    %c0_26 = arith.constant 0 : index
    %c0_27 = arith.constant 0 : index
    %54 = vector.load %arg4[%c5, %c0_26, %c0_27] : memref<15x8x128xf32, #tpu.memory_space<vmem>>, vector<1x8x128xf32>
    %55 = vector.shape_cast %54 : vector<1x8x128xf32> to vector<8x128xf32>
    %56 = vector.shape_cast %48 : vector<8x128xf32> to vector<1x8x128xf32>
    tpu.vector_store %arg4[%c5, %c0_26, %c0_27], %56 {strides = array<i32>} : memref<15x8x128xf32, #tpu.memory_space<vmem>>, vector<1x8x128xf32>,
    %c6 = arith.constant 6 : index
    %c0_28 = arith.constant 0 : index
    %c0_29 = arith.constant 0 : index
    %57 = vector.load %arg4[%c6, %c0_28, %c0_29] : memref<15x8x128xf32, #tpu.memory_space<vmem>>, vector<1x8x128xf32>
    %58 = vector.shape_cast %57 : vector<1x8x128xf32> to vector<8x128xf32>
    %59 = vector.shape_cast %53 : vector<8x128xf32> to vector<1x8x128xf32>
    tpu.vector_store %arg4[%c6, %c0_28, %c0_29], %59 {strides = array<i32>} : memref<15x8x128xf32, #tpu.memory_space<vmem>>, vector<1x8x128xf32>,
    %60 = arith.truncf %53 : vector<8x128xf32> to vector<8x128xbf16>
    %61 = vector.extract_strided_slice %8 {offsets = [56, 0], sizes = [8, 128], strides = [1, 1]} : vector<120x128xf32> to vector<8x128xf32>
    %cst_30 = arith.constant dense<0.000000e+00> : vector<8x128xf32>
    %62 = tpu.matmul %60, %0, %cst_30 {dimension_numbers = #tpu.dot_dimension_numbers<[1], [0], [0], [1], [0, 0, 1, 1], [], []>} : vector<8x128xbf16>, vector<128x128xbf16>, vector<8x128xf32> -> vector<8x128xf32>
    %63 = arith.addf %61, %62 : vector<8x128xf32>
    %64 = vector.extract_strided_slice %8 {offsets = [64, 0], sizes = [8, 128], strides = [1, 1]} : vector<120x128xf32> to vector<8x128xf32>
    %65 = vector.extract_strided_slice %10 {offsets = [56, 0], sizes = [8, 128], strides = [1, 1]} : vector<120x128xf32> to vector<8x128xf32>
    %66 = arith.addf %64, %65 : vector<8x128xf32>
    %cst_31 = arith.constant dense<0.000000e+00> : vector<8x128xf32>
    %67 = tpu.matmul %60, %2, %cst_31 {dimension_numbers = #tpu.dot_dimension_numbers<[1], [0], [0], [1], [0, 0, 1, 1], [], []>} : vector<8x128xbf16>, vector<128x128xbf16>, vector<8x128xf32> -> vector<8x128xf32>
    %68 = arith.addf %66, %67 : vector<8x128xf32>
    %c7 = arith.constant 7 : index
    %c0_32 = arith.constant 0 : index
    %c0_33 = arith.constant 0 : index
    %69 = vector.load %arg4[%c7, %c0_32, %c0_33] : memref<15x8x128xf32, #tpu.memory_space<vmem>>, vector<1x8x128xf32>
    %70 = vector.shape_cast %69 : vector<1x8x128xf32> to vector<8x128xf32>
    %71 = vector.shape_cast %63 : vector<8x128xf32> to vector<1x8x128xf32>
    tpu.vector_store %arg4[%c7, %c0_32, %c0_33], %71 {strides = array<i32>} : memref<15x8x128xf32, #tpu.memory_space<vmem>>, vector<1x8x128xf32>,
    %c8 = arith.constant 8 : index
    %c0_34 = arith.constant 0 : index
    %c0_35 = arith.constant 0 : index
    %72 = vector.load %arg4[%c8, %c0_34, %c0_35] : memref<15x8x128xf32, #tpu.memory_space<vmem>>, vector<1x8x128xf32>
    %73 = vector.shape_cast %72 : vector<1x8x128xf32> to vector<8x128xf32>
    %74 = vector.shape_cast %68 : vector<8x128xf32> to vector<1x8x128xf32>
    tpu.vector_store %arg4[%c8, %c0_34, %c0_35], %74 {strides = array<i32>} : memref<15x8x128xf32, #tpu.memory_space<vmem>>, vector<1x8x128xf32>,
    %75 = arith.truncf %68 : vector<8x128xf32> to vector<8x128xbf16>
    %76 = vector.extract_strided_slice %8 {offsets = [72, 0], sizes = [8, 128], strides = [1, 1]} : vector<120x128xf32> to vector<8x128xf32>
    %cst_36 = arith.constant dense<0.000000e+00> : vector<8x128xf32>
    %77 = tpu.matmul %75, %0, %cst_36 {dimension_numbers = #tpu.dot_dimension_numbers<[1], [0], [0], [1], [0, 0, 1, 1], [], []>} : vector<8x128xbf16>, vector<128x128xbf16>, vector<8x128xf32> -> vector<8x128xf32>
    %78 = arith.addf %76, %77 : vector<8x128xf32>
    %79 = vector.extract_strided_slice %8 {offsets = [80, 0], sizes = [8, 128], strides = [1, 1]} : vector<120x128xf32> to vector<8x128xf32>
    %80 = vector.extract_strided_slice %10 {offsets = [72, 0], sizes = [8, 128], strides = [1, 1]} : vector<120x128xf32> to vector<8x128xf32>
    %81 = arith.addf %79, %80 : vector<8x128xf32>
    %cst_37 = arith.constant dense<0.000000e+00> : vector<8x128xf32>
    %82 = tpu.matmul %75, %2, %cst_37 {dimension_numbers = #tpu.dot_dimension_numbers<[1], [0], [0], [1], [0, 0, 1, 1], [], []>} : vector<8x128xbf16>, vector<128x128xbf16>, vector<8x128xf32> -> vector<8x128xf32>
    %83 = arith.addf %81, %82 : vector<8x128xf32>
    %c9 = arith.constant 9 : index
    %c0_38 = arith.constant 0 : index
    %c0_39 = arith.constant 0 : index
    %84 = vector.load %arg4[%c9, %c0_38, %c0_39] : memref<15x8x128xf32, #tpu.memory_space<vmem>>, vector<1x8x128xf32>
    %85 = vector.shape_cast %84 : vector<1x8x128xf32> to vector<8x128xf32>
    %86 = vector.shape_cast %78 : vector<8x128xf32> to vector<1x8x128xf32>
    tpu.vector_store %arg4[%c9, %c0_38, %c0_39], %86 {strides = array<i32>} : memref<15x8x128xf32, #tpu.memory_space<vmem>>, vector<1x8x128xf32>,
    %c10 = arith.constant 10 : index
    %c0_40 = arith.constant 0 : index
    %c0_41 = arith.constant 0 : index
    %87 = vector.load %arg4[%c10, %c0_40, %c0_41] : memref<15x8x128xf32, #tpu.memory_space<vmem>>, vector<1x8x128xf32>
    %88 = vector.shape_cast %87 : vector<1x8x128xf32> to vector<8x128xf32>
    %89 = vector.shape_cast %83 : vector<8x128xf32> to vector<1x8x128xf32>
    tpu.vector_store %arg4[%c10, %c0_40, %c0_41], %89 {strides = array<i32>} : memref<15x8x128xf32, #tpu.memory_space<vmem>>, vector<1x8x128xf32>,
    %90 = arith.truncf %83 : vector<8x128xf32> to vector<8x128xbf16>
    %91 = vector.extract_strided_slice %8 {offsets = [88, 0], sizes = [8, 128], strides = [1, 1]} : vector<120x128xf32> to vector<8x128xf32>
    %cst_42 = arith.constant dense<0.000000e+00> : vector<8x128xf32>
    %92 = tpu.matmul %90, %0, %cst_42 {dimension_numbers = #tpu.dot_dimension_numbers<[1], [0], [0], [1], [0, 0, 1, 1], [], []>} : vector<8x128xbf16>, vector<128x128xbf16>, vector<8x128xf32> -> vector<8x128xf32>
    %93 = arith.addf %91, %92 : vector<8x128xf32>
    %94 = vector.extract_strided_slice %8 {offsets = [96, 0], sizes = [8, 128], strides = [1, 1]} : vector<120x128xf32> to vector<8x128xf32>
    %95 = vector.extract_strided_slice %10 {offsets = [88, 0], sizes = [8, 128], strides = [1, 1]} : vector<120x128xf32> to vector<8x128xf32>
    %96 = arith.addf %94, %95 : vector<8x128xf32>
    %cst_43 = arith.constant dense<0.000000e+00> : vector<8x128xf32>
    %97 = tpu.matmul %90, %2, %cst_43 {dimension_numbers = #tpu.dot_dimension_numbers<[1], [0], [0], [1], [0, 0, 1, 1], [], []>} : vector<8x128xbf16>, vector<128x128xbf16>, vector<8x128xf32> -> vector<8x128xf32>
    %98 = arith.addf %96, %97 : vector<8x128xf32>
    %c11 = arith.constant 11 : index
    %c0_44 = arith.constant 0 : index
    %c0_45 = arith.constant 0 : index
    %99 = vector.load %arg4[%c11, %c0_44, %c0_45] : memref<15x8x128xf32, #tpu.memory_space<vmem>>, vector<1x8x128xf32>
    %100 = vector.shape_cast %99 : vector<1x8x128xf32> to vector<8x128xf32>
    %101 = vector.shape_cast %93 : vector<8x128xf32> to vector<1x8x128xf32>
    tpu.vector_store %arg4[%c11, %c0_44, %c0_45], %101 {strides = array<i32>} : memref<15x8x128xf32, #tpu.memory_space<vmem>>, vector<1x8x128xf32>,
    %c12 = arith.constant 12 : index
    %c0_46 = arith.constant 0 : index
    %c0_47 = arith.constant 0 : index
    %102 = vector.load %arg4[%c12, %c0_46, %c0_47] : memref<15x8x128xf32, #tpu.memory_space<vmem>>, vector<1x8x128xf32>
    %103 = vector.shape_cast %102 : vector<1x8x128xf32> to vector<8x128xf32>
    %104 = vector.shape_cast %98 : vector<8x128xf32> to vector<1x8x128xf32>
    tpu.vector_store %arg4[%c12, %c0_46, %c0_47], %104 {strides = array<i32>} : memref<15x8x128xf32, #tpu.memory_space<vmem>>, vector<1x8x128xf32>,
    %105 = arith.truncf %98 : vector<8x128xf32> to vector<8x128xbf16>
    %106 = vector.extract_strided_slice %8 {offsets = [104, 0], sizes = [8, 128], strides = [1, 1]} : vector<120x128xf32> to vector<8x128xf32>
    %cst_48 = arith.constant dense<0.000000e+00> : vector<8x128xf32>
    %107 = tpu.matmul %105, %0, %cst_48 {dimension_numbers = #tpu.dot_dimension_numbers<[1], [0], [0], [1], [0, 0, 1, 1], [], []>} : vector<8x128xbf16>, vector<128x128xbf16>, vector<8x128xf32> -> vector<8x128xf32>
    %108 = arith.addf %106, %107 : vector<8x128xf32>
    %109 = vector.extract_strided_slice %8 {offsets = [112, 0], sizes = [8, 128], strides = [1, 1]} : vector<120x128xf32> to vector<8x128xf32>
    %110 = vector.extract_strided_slice %10 {offsets = [104, 0], sizes = [8, 128], strides = [1, 1]} : vector<120x128xf32> to vector<8x128xf32>
    %111 = arith.addf %109, %110 : vector<8x128xf32>
    %cst_49 = arith.constant dense<0.000000e+00> : vector<8x128xf32>
    %112 = tpu.matmul %105, %2, %cst_49 {dimension_numbers = #tpu.dot_dimension_numbers<[1], [0], [0], [1], [0, 0, 1, 1], [], []>} : vector<8x128xbf16>, vector<128x128xbf16>, vector<8x128xf32> -> vector<8x128xf32>
    %113 = arith.addf %111, %112 : vector<8x128xf32>
    %c13 = arith.constant 13 : index
    %c0_50 = arith.constant 0 : index
    %c0_51 = arith.constant 0 : index
    %114 = vector.load %arg4[%c13, %c0_50, %c0_51] : memref<15x8x128xf32, #tpu.memory_space<vmem>>, vector<1x8x128xf32>
    %115 = vector.shape_cast %114 : vector<1x8x128xf32> to vector<8x128xf32>
    %116 = vector.shape_cast %108 : vector<8x128xf32> to vector<1x8x128xf32>
    tpu.vector_store %arg4[%c13, %c0_50, %c0_51], %116 {strides = array<i32>} : memref<15x8x128xf32, #tpu.memory_space<vmem>>, vector<1x8x128xf32>,
    %c14 = arith.constant 14 : index
    %c0_52 = arith.constant 0 : index
    %c0_53 = arith.constant 0 : index
    %117 = vector.load %arg4[%c14, %c0_52, %c0_53] : memref<15x8x128xf32, #tpu.memory_space<vmem>>, vector<1x8x128xf32>
    %118 = vector.shape_cast %117 : vector<1x8x128xf32> to vector<8x128xf32>
    %119 = vector.shape_cast %113 : vector<8x128xf32> to vector<1x8x128xf32>
    tpu.vector_store %arg4[%c14, %c0_52, %c0_53], %119 {strides = array<i32>} : memref<15x8x128xf32, #tpu.memory_space<vmem>>, vector<1x8x128xf32>,
    return
  }
}

</mosaic_0001>

<bundles_post_ra>
// kernel: tpu_custom_call.1
= control target key start
LH: loop header
LB: loop body
LE: loop exit
PB: predicated region body
PF: predicated region fallthrough
CT: control target
= control target key end

     0   :  { %9 = vsyncpa [#allocation3], 0  ;;  %s1052_s0 = inlined_call_operand.vmem [shape: bf16[120,10], index: 0, kind: input, shape index: {}]   ;;  %s1053_s1 = inlined_call_operand.hbm [shape: bf16[10,128], index: 1, kind: input, shape index: {}]   ;;  %s1054_s2 = inlined_call_operand.vmem [shape: bf16[128,128], index: 2, kind: input, shape index: {}]   ;;  %s1055_s3 = inlined_call_operand.vmem [shape: f32[1,128], index: 3, kind: input, shape index: {}]   ;;  %s1056_s4 = inlined_call_operand.hbm [shape: f32[15,8,128], index: 4, kind: output, shape index: {}]  }
   0x1   :  { %10 = vsyncpa [#allocation4], 0  ;;  %s17_s17 = sshll.u32 %s1053_s1, 4  ;;  %s750_s18 = smov [#allocation2]   ;;  %s18_s17 = int_to_ptr.hbm [resolvable:$true] %s17_s17 }
   0x2   :  { %s19_s19 = sshll.u32 %s750_s18, 4  ;;  %s751_s20 = smov 64   ;;  %s20_s19 = int_to_ptr.vmem [resolvable:$true] %s19_s19 }
   0x3   :  { %s752_s21 = smov 4  }
   0x4   :  { %25 = dma.hbm_to_vmem [thread:$0]  %s18_s17, 128, %s20_s19, [#allocation3], %s751_s20, %s751_s20, %s752_s21  }
   0x5   :  { %746 = dma.done.wait [#allocation3], 128  }
   0x6   :  { %747 = vsyncadd [#allocation3], 4294967168  ;;  %v787_v0 = vld [vmem:[%s1054_s2 + $0x38] sm:$0xff]  ;;  %v793_v1 = vld [vmem:[%s1054_s2 + $0x30] sm:$0xff]  ;;  %vm245_vm0 = vcmask 1044480   ;;  %vm220_vm1 = vcmask 80896  }
   0x7   :  { %99 = vmatpush.bf16.msra.mxu0 %v787_v0  ;;  %v665_v2 = vld [vmem:[#allocation2] sm:$0xf]  ;;  %v690_v3 = vld [vmem:[#allocation2] sm:$0x10]  ;;  %347 = vmatpush.bf16.msra.mxu3 %v787_v0  ;;  %v804_v7 = vld [vmem:[%s1054_s2 + $0x28] sm:$0xff]  ;;  %s590_s29 = sshll.u32 %s1056_s4, 4  ;;  %s591_s29 = int_to_ptr.hbm [resolvable:$true] %s590_s29 }
   0x8   :  { %v666_v4 = vor.u32 %v690_v3, %v665_v2  ;;  %305 = vmatpush.bf16.msra.mxu2 %v787_v0  ;;  %v683_v6 = vld [vmem:[%s1052_s0] sm:$0xff]  ;;  %v823_v9 = vld [vmem:[%s1054_s2 + $0x18] sm:$0xff]  ;;  %v832_v10 = vld [vmem:[%s1054_s2 + $0x10] sm:$0xff]  ;;  %s754_s30 = smov 128   ;;  %s755_s5 = smov 8  }
   0x9   :  { %v814_v8 = vld [vmem:[%s1054_s2 + $0x20] sm:$0xff]  ;;  %v841_v11 = vld [vmem:[%s1054_s2 + $0x8] sm:$0xff]  ;;  %v685_v48 = vld [vmem:[%s1052_s0 + $0x10] sm:$0xff] }
   0xa   :  { %v247_v5 = vsel %vm245_vm0, %v666_v4, 0  ;;  %v850_v12 = vld [vmem:[%s1054_s2] sm:$0xff]  ;;  %v684_v37 = vld [vmem:[%s1052_s0 + $0x8] sm:$0xff]  ;;  %v686_v61 = vld [vmem:[%s1052_s0 + $0x18] sm:$0xff] }
   0xb   :  { %100 = vmatpush.bf16.msra.mxu0 %v793_v1  ;;  %256 = vmatpush.bf16.msra.mxu1 %v247_v5  ;;  %v886_v13 = vld [vmem:[%s1055_s3] ss:$0 sm:$0xff] }
   0xc   :  { %348 = vmatpush.bf16.msra.mxu3 %v793_v1  ;;  %306 = vmatpush.bf16.msra.mxu2 %v793_v1  ;;  %v687_v62 = vld [vmem:[%s1052_s0 + $0x20] sm:$0xff] }
   0xe   :  { %667 = vmatmul.msk.bf16.vlgmr.msra.gmra.mxu1 %vm220_vm1, %v683_v6  ;;  %v688_v6 = vld [vmem:[%s1052_s0 + $0x28] sm:$0xff] }
   0xf   :  { %415 = vmatpush.bf16.msrb.mxu1 %v787_v0  ;;  %101 = vmatpush.bf16.msra.mxu0 %v804_v7 }
  0x10   :  { %349 = vmatpush.bf16.msra.mxu3 %v804_v7  ;;  %307 = vmatpush.bf16.msra.mxu2 %v804_v7 }
  0x13   :  { %416 = vmatpush.bf16.msrb.mxu1 %v793_v1  ;;  %102 = vmatpush.bf16.msra.mxu0 %v814_v8 }
  0x14   :  { %350 = vmatpush.bf16.msra.mxu3 %v814_v8  ;;  %308 = vmatpush.bf16.msra.mxu2 %v814_v8 }
  0x17   :  { %417 = vmatpush.bf16.msrb.mxu1 %v804_v7  ;;  %103 = vmatpush.bf16.msra.mxu0 %v823_v9 }
  0x18   :  { %351 = vmatpush.bf16.msra.mxu3 %v823_v9  ;;  %309 = vmatpush.bf16.msra.mxu2 %v823_v9 }
  0x1b   :  { %418 = vmatpush.bf16.msrb.mxu1 %v814_v8  ;;  %104 = vmatpush.bf16.msra.mxu0 %v832_v10 }
  0x1c   :  { %352 = vmatpush.bf16.msra.mxu3 %v832_v10  ;;  %310 = vmatpush.bf16.msra.mxu2 %v832_v10 }
  0x1e   :  { %668 = vmatmul.msk.bf16.gmra.mxu1 %vm220_vm1, %v684_v37 }
  0x1f   :  { %419 = vmatpush.bf16.msrb.mxu1 %v823_v9  ;;  %105 = vmatpush.bf16.msra.mxu0 %v841_v11 }
  0x20   :  { %353 = vmatpush.bf16.msra.mxu3 %v841_v11  ;;  %311 = vmatpush.bf16.msra.mxu2 %v841_v11 }
  0x23   :  { %420 = vmatpush.bf16.msrb.mxu1 %v832_v10  ;;  %106 = vmatpush.bf16.msra.mxu0 %v850_v12 }
  0x24   :  { %354 = vmatpush.bf16.msra.mxu3 %v850_v12  ;;  %312 = vmatpush.bf16.msra.mxu2 %v850_v12 }
  0x26   :  { %107 = vmatmul.bf16.vlgmr.msra.gmra.mxu0 %v850_v12 }
  0x27   :  { %421 = vmatpush.bf16.msrb.mxu1 %v841_v11 }
  0x28   :  { %449 = vmatpush.bf16.msrb.mxu2 %v787_v0 }
  0x2b   :  { %422 = vmatpush.bf16.msrb.mxu1 %v850_v12 }
  0x2c   :  { %450 = vmatpush.bf16.msrb.mxu2 %v793_v1 }
  0x2e   :  { %669 = vmatmul.msk.bf16.gmra.mxu1 %vm220_vm1, %v685_v48 }
  0x2f   :  { %483 = vmatpush.bf16.msra.mxu1 %v787_v0 }
  0x30   :  { %451 = vmatpush.bf16.msrb.mxu2 %v804_v7 }
  0x33   :  { %484 = vmatpush.bf16.msra.mxu1 %v793_v1 }
  0x34   :  { %452 = vmatpush.bf16.msrb.mxu2 %v814_v8 }
  0x36   :  { %112 = vmatmul.bf16.gmra.mxu0 %v841_v11 }
  0x37   :  { %485 = vmatpush.bf16.msra.mxu1 %v804_v7 }
  0x38   :  { %453 = vmatpush.bf16.msrb.mxu2 %v823_v9 }
  0x3b   :  { %486 = vmatpush.bf16.msra.mxu1 %v814_v8 }
  0x3c   :  { %454 = vmatpush.bf16.msrb.mxu2 %v832_v10 }
  0x3e   :  { %670 = vmatmul.msk.bf16.gmra.mxu1 %vm220_vm1, %v686_v61 }
  0x3f   :  { %487 = vmatpush.bf16.msra.mxu1 %v823_v9 }
  0x40   :  { %455 = vmatpush.bf16.msrb.mxu2 %v841_v11 }
  0x43   :  { %488 = vmatpush.bf16.msra.mxu1 %v832_v10 }
  0x44   :  { %456 = vmatpush.bf16.msrb.mxu2 %v850_v12 }
  0x46   :  { %117 = vmatmul.bf16.gmra.mxu0 %v832_v10 }
  0x47   :  { %489 = vmatpush.bf16.msra.mxu1 %v841_v11 }
  0x4b   :  { %490 = vmatpush.bf16.msra.mxu1 %v850_v12 }
  0x4e   :  { %671 = vmatmul.msk.bf16.gmra.mxu1 %vm220_vm1, %v687_v62 }
  0x56   :  { %122 = vmatmul.bf16.gmra.mxu0 %v823_v9 }
  0x5e   :  { %672 = vmatmul.msk.bf16.gmra.mxu1 %vm220_vm1, %v688_v6 }
  0x66   :  { %127 = vmatmul.bf16.gmra.mxu0 %v814_v8 }
  0x76   :  { %132 = vmatmul.bf16.gmra.mxu0 %v804_v7 }
  0x86   :  { %137 = vmatmul.bf16.gmra.mxu0 %v793_v1 }
  0x8b   :  { %v258_v14 = vpop.f32.mrf.mxu1 }
  0x8c   :  { %v259_v15 = vadd.f32 %v886_v13, %v258_v14  ;;  %v689_v14 = vld [vmem:[%s1052_s0 + $0x30] sm:$0xff] }
  0x8d   :  { %673 = vmatmul.msk.bf16.gmra.mxu1 %vm220_vm1, %v689_v14 }
  0x8e   :  { %345 = vst [vmem:[#allocation5] sm:$0xff] %v259_v15  ;;  %v346_v16 = vpack.c.bf16 %v259_v15, %v259_v15 }
  0x90   :  { %355 = vmatmul.bf16.vlgmr.msra.gmra.mxu3 %v346_v16 }
  0x93   :  { %v260_v33 = vpop.f32.mrf.mxu1 }
  0x94   :  { %v261_v34 = vadd.f32 %v886_v13, %v260_v33 }
  0x96   :  { %142 = vmatmul.bf16.gmra.mxu0 %v787_v0  ;;  %v297_v35 = vpack.c.bf16 %v261_v34, %v259_v15 }
  0x98   :  { %313 = vmatmul.bf16.vlgmr.msra.gmra.mxu2 %v297_v35 }
  0x99   :  { %517 = vmatpush.bf16.msra.mxu2 %v787_v0 }
  0x9b   :  { %v263_v50 = vpop.f32.mrf.mxu1 }
  0x9c   :  { %v264_v52 = vadd.f32 %v886_v13, %v263_v50 }
  0x9d   :  { %518 = vmatpush.bf16.msra.mxu2 %v793_v1 }
  0xa1   :  { %519 = vmatpush.bf16.msra.mxu2 %v804_v7 }
  0xa3   :  { %v108_v17 = vpop.f32.mrf.mxu0  ;;  %v265_v51 = vpop.f32.mrf.mxu1 }
  0xa4   :  { %v266_v53 = vadd.f32 %v886_v13, %v265_v51 }
  0xa5   :  { %520 = vmatpush.bf16.msra.mxu2 %v814_v8 }
  0xa6   :  { %v298_v54 = vpack.c.bf16 %v266_v53, %v264_v52 }
  0xa8   :  { %317 = vmatmul.bf16.gmra.mxu2 %v298_v54 }
  0xa9   :  { %521 = vmatpush.bf16.msra.mxu2 %v823_v9 }
  0xab   :  { %v110_v18 = vpop.f32.mrf.mxu0  ;;  %v268_v63 = vpop.f32.mrf.mxu1 }
  0xac   :  { %v890_v19 = vpack.c.bf16 %v110_v18, %v108_v17  ;;  %v269_v2 = vadd.f32 %v886_v13, %v268_v63 }
  0xad   :  { %522 = vmatpush.bf16.msra.mxu2 %v832_v10 }
  0xb1   :  { %523 = vmatpush.bf16.msra.mxu2 %v841_v11 }
  0xb3   :  { %v113_v20 = vpop.f32.mrf.mxu0  ;;  %v270_v3 = vpop.f32.mrf.mxu1 }
  0xb4   :  { %v989_v4 = vadd.f32 %v886_v13, %v270_v3 }
  0xb5   :  { %524 = vmatpush.bf16.msra.mxu2 %v850_v12 }
  0xb6   :  { %v299_v5 = vpack.c.bf16 %v989_v4, %v269_v2 }
  0xb8   :  { %321 = vmatmul.bf16.gmra.mxu2 %v299_v5 }
  0xbb   :  { %v115_v21 = vpop.f32.mrf.mxu0 }
  0xbc   :  { %v892_v22 = vpack.c.bf16 %v115_v21, %v113_v20 }
  0xc3   :  { %v118_v23 = vpop.f32.mrf.mxu0 }
  0xcb   :  { %v120_v24 = vpop.f32.mrf.mxu0 }
  0xcc   :  { %v894_v25 = vpack.c.bf16 %v120_v24, %v118_v23 }
  0xd3   :  { %v123_v26 = vpop.f32.mrf.mxu0 }
  0xdb   :  { %v125_v27 = vpop.f32.mrf.mxu0 }
  0xdc   :  { %v896_v28 = vpack.c.bf16 %v125_v27, %v123_v26 }
  0xe3   :  { %v128_v29 = vpop.f32.mrf.mxu0 }
  0xeb   :  { %v130_v30 = vpop.f32.mrf.mxu0 }
  0xec   :  { %v923_v47 = vpack.c.bf16 %v130_v30, %v128_v29 }
  0xf3   :  { %v133_v31 = vpop.f32.mrf.mxu0 }
  0xfb   :  { %v135_v32 = vpop.f32.mrf.mxu0 }
  0xfc   :  { %v919_v46 = vpack.c.bf16 %v135_v32, %v133_v31  ;;  %v273_v31 = vpop.f32.mrf.mxu1 }
  0xfd   :  { %v274_v33 = vadd.f32 %v886_v13, %v273_v31 }
 0x103   :  { %v138_v36 = vpop.f32.mrf.mxu0 }
 0x10b   :  { %v140_v38 = vpop.f32.mrf.mxu0 }
 0x10c   :  { %v914_v45 = vpack.c.bf16 %v140_v38, %v138_v36 }
 0x113   :  { %v143_v39 = vpop.f32.mrf.mxu0  ;;  %v356_v40 = vpop.f32.mrf.mxu3 }
 0x114   :  { %v360_v41 = vadd.f32 %v356_v40, %v261_v34  ;;  %v275_v34 = vpop.f32.mrf.mxu1 }
 0x115   :  { %v1014_v35 = vadd.f32 %v886_v13, %v275_v34 }
 0x116   :  { %377 = vst [vmem:[#allocation5 + $0x8] sm:$0xff] %v360_v41 }
 0x117   :  { %v300_v36 = vpack.c.bf16 %v1014_v35, %v274_v33 }
 0x119   :  { %325 = vmatmul.bf16.gmra.mxu2 %v300_v36 }
 0x11b   :  { %v145_v42 = vpop.f32.mrf.mxu0  ;;  %v358_v43 = vpop.f32.mrf.mxu3 }
 0x11c   :  { %v909_v44 = vpack.c.bf16 %v145_v42, %v143_v39  ;;  %v314_v49 = vpop.f32.mrf.mxu2 }
 0x11e   :  { %362 = vmatpush.bf16.msrb.mxu3 %v909_v44  ;;  %430 = vmatpush.bf16.msrb.mxu0 %v909_v44 }
 0x122   :  { %363 = vmatpush.bf16.msrb.mxu3 %v914_v45  ;;  %431 = vmatpush.bf16.msrb.mxu0 %v914_v45 }
 0x124   :  { %v315_v55 = vpop.f32.mrf.mxu2 }
 0x125   :  { %v361_v56 = vadd.f32 %v315_v55, %v264_v52 }
 0x126   :  { %364 = vmatpush.bf16.msrb.mxu3 %v919_v46  ;;  %432 = vmatpush.bf16.msrb.mxu0 %v919_v46 }
 0x12a   :  { %365 = vmatpush.bf16.msrb.mxu3 %v923_v47  ;;  %433 = vmatpush.bf16.msrb.mxu0 %v923_v47 }
 0x12c   :  { %v318_v15 = vpop.f32.mrf.mxu2 }
 0x12e   :  { %366 = vmatpush.bf16.msrb.mxu3 %v896_v28  ;;  %434 = vmatpush.bf16.msrb.mxu0 %v896_v28 }
 0x132   :  { %367 = vmatpush.bf16.msrb.mxu3 %v894_v25  ;;  %435 = vmatpush.bf16.msrb.mxu0 %v894_v25 }
 0x134   :  { %v319_v24 = vpop.f32.mrf.mxu2 }
 0x135   :  { %v395_v26 = vadd.f32 %v319_v24, %v269_v2 }
 0x136   :  { %368 = vmatpush.bf16.msrb.mxu3 %v892_v22  ;;  %436 = vmatpush.bf16.msrb.mxu0 %v892_v22 }
 0x13a   :  { %369 = vmatpush.bf16.msrb.mxu3 %v890_v19  ;;  %437 = vmatpush.bf16.msrb.mxu0 %v890_v19 }
 0x13d   :  { %370 = vmatmul.bf16.vlgmr.msrb.gmra.mxu3 %v346_v16  ;;  %v170_v16 = vld [vmem:[%s1052_s0 + $0x38] sm:$0xf]  ;;  %s753_s0 = smov [#allocation5]  }
 0x13e   :  { %381 = vmatpush.bf16.msra.mxu3 %v787_v0  ;;  %498 = vmatpush.bf16.msra.mxu0 %v909_v44  ;;  %v206_v17 = vunpack.c.l.b16 %v170_v16  ;;  %s588_s26 = sshll.u32 %s753_s0, 4  ;;  %s589_s26 = int_to_ptr.vmem [resolvable:$true] %s588_s26 }
 0x140   :  { %v214_v18 = vpack.c.b16 %v206_v17, %v206_v17 }
 0x142   :  { %382 = vmatpush.bf16.msra.mxu3 %v793_v1  ;;  %499 = vmatpush.bf16.msra.mxu0 %v914_v45 }
 0x143   :  { %674 = vmatmul.msk.bf16.gmra.mxu1 %vm220_vm1, %v214_v18 }
 0x146   :  { %383 = vmatpush.bf16.msra.mxu3 %v804_v7  ;;  %500 = vmatpush.bf16.msra.mxu0 %v919_v46 }
 0x14a   :  { %384 = vmatpush.bf16.msra.mxu3 %v814_v8  ;;  %501 = vmatpush.bf16.msra.mxu0 %v923_v47 }
 0x14e   :  { %385 = vmatpush.bf16.msra.mxu3 %v823_v9  ;;  %502 = vmatpush.bf16.msra.mxu0 %v896_v28 }
 0x152   :  { %386 = vmatpush.bf16.msra.mxu3 %v832_v10  ;;  %503 = vmatpush.bf16.msra.mxu0 %v894_v25 }
 0x156   :  { %387 = vmatpush.bf16.msra.mxu3 %v841_v11  ;;  %504 = vmatpush.bf16.msra.mxu0 %v892_v22 }
 0x15a   :  { %388 = vmatpush.bf16.msra.mxu3 %v850_v12  ;;  %505 = vmatpush.bf16.msra.mxu0 %v890_v19 }
 0x15e   :  { %396 = vmatpush.bf16.msrb.mxu3 %v909_v44 }
 0x162   :  { %397 = vmatpush.bf16.msrb.mxu3 %v914_v45 }
 0x166   :  { %398 = vmatpush.bf16.msrb.mxu3 %v919_v46 }
 0x16a   :  { %399 = vmatpush.bf16.msrb.mxu3 %v923_v47 }
 0x16e   :  { %400 = vmatpush.bf16.msrb.mxu3 %v896_v28 }
 0x172   :  { %401 = vmatpush.bf16.msrb.mxu3 %v894_v25 }
 0x176   :  { %402 = vmatpush.bf16.msrb.mxu3 %v892_v22 }
 0x17a   :  { %403 = vmatpush.bf16.msrb.mxu3 %v890_v19 }
 0x1c0   :  { %v371_v57 = vpop.f32.mrf.mxu3 }
 0x1c1   :  { %v375_v58 = vadd.f32 %v371_v57, %v361_v56 }
 0x1c3   :  { %379 = vst [vmem:[#allocation5 + $0x10] sm:$0xff] %v375_v58  ;;  %v380_v59 = vpack.c.bf16 %v375_v58, %v375_v58 }
 0x1c5   :  { %389 = vmatmul.bf16.vlgmr.msra.gmra.mxu3 %v380_v59 }
 0x1c6   :  { %464 = vmatpush.bf16.msra.mxu3 %v909_v44 }
 0x1c8   :  { %v373_v60 = vpop.f32.mrf.mxu3 }
 0x1ca   :  { %465 = vmatpush.bf16.msra.mxu3 %v914_v45 }
 0x1ce   :  { %466 = vmatpush.bf16.msra.mxu3 %v919_v46 }
 0x1d2   :  { %467 = vmatpush.bf16.msra.mxu3 %v923_v47 }
 0x1d5   :  { %404 = vmatmul.bf16.vlgmr.msrb.gmra.mxu3 %v380_v59 }
 0x1d6   :  { %468 = vmatpush.bf16.msra.mxu3 %v896_v28 }
 0x1da   :  { %469 = vmatpush.bf16.msra.mxu3 %v894_v25 }
 0x1de   :  { %470 = vmatpush.bf16.msra.mxu3 %v892_v22 }
 0x1e2   :  { %471 = vmatpush.bf16.msra.mxu3 %v890_v19 }
 0x1e6   :  { %532 = vmatpush.bf16.msrb.mxu3 %v909_v44 }
 0x1ea   :  { %533 = vmatpush.bf16.msrb.mxu3 %v914_v45 }
 0x1ee   :  { %534 = vmatpush.bf16.msrb.mxu3 %v919_v46 }
 0x1f2   :  { %535 = vmatpush.bf16.msrb.mxu3 %v923_v47 }
 0x1f6   :  { %536 = vmatpush.bf16.msrb.mxu3 %v896_v28 }
 0x1fa   :  { %537 = vmatpush.bf16.msrb.mxu3 %v894_v25 }
 0x1fe   :  { %538 = vmatpush.bf16.msrb.mxu3 %v892_v22 }
 0x202   :  { %539 = vmatpush.bf16.msrb.mxu3 %v890_v19 }
 0x248   :  { %v390_v20 = vpop.f32.mrf.mxu3 }
 0x249   :  { %v394_v21 = vadd.f32 %v390_v20, %v266_v53 }
 0x24b   :  { %411 = vst [vmem:[#allocation5 + $0x18] sm:$0xff] %v394_v21 }
 0x250   :  { %v392_v23 = vpop.f32.mrf.mxu3 }
 0x258   :  { %v405_v27 = vpop.f32.mrf.mxu3 }
 0x259   :  { %v409_v29 = vadd.f32 %v405_v27, %v395_v26 }
 0x25b   :  { %413 = vst [vmem:[#allocation5 + $0x20] sm:$0xff] %v409_v29  ;;  %v414_v30 = vpack.c.bf16 %v409_v29, %v409_v29 }
 0x25d   :  { %423 = vmatmul.bf16.vlgmr.msrb.gmra.mxu1 %v414_v30  ;;  %438 = vmatmul.bf16.vlgmr.msrb.gmra.mxu0 %v414_v30 }
 0x25e   :  { %566 = vmatpush.bf16.msrb.mxu0 %v909_v44  ;;  %551 = vmatpush.bf16.msrb.mxu1 %v787_v0  ;;  %v278_v0 = vpop.f32.mrf.mxu1 }
 0x260   :  { %v407_v32 = vpop.f32.mrf.mxu3 }
 0x262   :  { %567 = vmatpush.bf16.msrb.mxu0 %v914_v45  ;;  %552 = vmatpush.bf16.msrb.mxu1 %v793_v1  ;;  %v279_v1 = vadd.f32 %v886_v13, %v278_v0 }
 0x266   :  { %568 = vmatpush.bf16.msrb.mxu0 %v919_v46  ;;  %553 = vmatpush.bf16.msrb.mxu1 %v804_v7  ;;  %v280_v7 = vpop.f32.mrf.mxu1 }
 0x267   :  { %v281_v37 = vadd.f32 %v886_v13, %v280_v7 }
 0x26a   :  { %569 = vmatpush.bf16.msrb.mxu0 %v923_v47  ;;  %554 = vmatpush.bf16.msrb.mxu1 %v814_v8  ;;  %v301_v8 = vpack.c.bf16 %v281_v37, %v279_v1 }
 0x26c   :  { %329 = vmatmul.bf16.gmra.mxu2 %v301_v8 }
 0x26e   :  { %570 = vmatpush.bf16.msrb.mxu0 %v896_v28  ;;  %555 = vmatpush.bf16.msrb.mxu1 %v823_v9  ;;  %v283_v9 = vpop.f32.mrf.mxu1  ;;  %v322_v28 = vpop.f32.mrf.mxu2 }
 0x272   :  { %571 = vmatpush.bf16.msrb.mxu0 %v894_v25  ;;  %556 = vmatpush.bf16.msrb.mxu1 %v832_v10  ;;  %v284_v25 = vadd.f32 %v886_v13, %v283_v9 }
 0x276   :  { %572 = vmatpush.bf16.msrb.mxu0 %v892_v22  ;;  %557 = vmatpush.bf16.msrb.mxu1 %v841_v11  ;;  %v285_v10 = vpop.f32.mrf.mxu1  ;;  %v323_v45 = vpop.f32.mrf.mxu2 }
 0x277   :  { %v1031_v38 = vadd.f32 %v886_v13, %v285_v10  ;;  %v429_v46 = vadd.f32 %v323_v45, %v274_v33 }
 0x279   :  { %v302_v22 = vpack.c.bf16 %v1031_v38, %v284_v25 }
 0x27a   :  { %573 = vmatpush.bf16.msrb.mxu0 %v890_v19  ;;  %558 = vmatpush.bf16.msrb.mxu1 %v850_v12 }
 0x27c   :  { %333 = vmatmul.bf16.gmra.mxu2 %v302_v22 }
 0x27e   :  { %v288_v11 = vpop.f32.mrf.mxu1  ;;  %v326_v53 = vpop.f32.mrf.mxu2 }
 0x27f   :  { %v289_v39 = vadd.f32 %v886_v13, %v288_v11 }
 0x286   :  { %v290_v40 = vpop.f32.mrf.mxu1  ;;  %v327_v54 = vpop.f32.mrf.mxu2 }
 0x287   :  { %v1036_v19 = vadd.f32 %v886_v13, %v290_v40  ;;  %v463_v63 = vadd.f32 %v327_v54, %v279_v1 }
 0x289   :  { %v303_v12 = vpack.c.bf16 %v1036_v19, %v289_v39 }
 0x28c   :  { %337 = vmatmul.bf16.gmra.mxu2 %v303_v12 }
 0x28e   :  { %v293_v41 = vpop.f32.mrf.mxu1 }
 0x28f   :  { %v1040_v42 = vadd.f32 %v886_v13, %v293_v41 }
 0x291   :  { %v304_v43 = vpack.c.bf16 %v1040_v42, %v1040_v42 }
 0x296   :  { %v295_v44 = vpop.f32.mrf.mxu1 }
 0x29c   :  { %341 = vmatmul.bf16.gmra.mxu2 %v304_v43 }
 0x2da   :  { %v424_v47 = vpop.f32.mrf.mxu1  ;;  %v439_v48 = vpop.f32.mrf.mxu0 }
 0x2db   :  { %v428_v49 = vadd.f32 %v424_v47, %v989_v4  ;;  %v443_v50 = vadd.f32 %v439_v48, %v429_v46 }
 0x2dd   :  { %445 = vst [vmem:[#allocation5 + $0x28] sm:$0xff] %v428_v49  ;;  %v448_v51 = vpack.c.bf16 %v443_v50, %v443_v50 }
 0x2de   :  { %447 = vst [vmem:[#allocation5 + $0x30] sm:$0xff] %v443_v50 }
 0x2df   :  { %457 = vmatmul.bf16.vlgmr.msrb.gmra.mxu2 %v448_v51  ;;  %472 = vmatmul.bf16.vlgmr.msra.gmra.mxu3 %v448_v51 }
 0x2e2   :  { %v426_v52 = vpop.f32.mrf.mxu1  ;;  %v441_v13 = vpop.f32.mrf.mxu0 }
 0x2ef   :  { %v330_v55 = vpop.f32.mrf.mxu2 }
 0x2f7   :  { %v331_v56 = vpop.f32.mrf.mxu2 }
 0x2f8   :  { %v497_v16 = vadd.f32 %v331_v56, %v284_v25 }
 0x2ff   :  { %v334_v57 = vpop.f32.mrf.mxu2 }
 0x307   :  { %v335_v58 = vpop.f32.mrf.mxu2 }
 0x308   :  { %v531_v27 = vadd.f32 %v335_v58, %v289_v39 }
 0x30f   :  { %v338_v59 = vpop.f32.mrf.mxu2 }
 0x317   :  { %v339_v60 = vpop.f32.mrf.mxu2 }
 0x318   :  { %v565_v36 = vadd.f32 %v339_v60, %v1040_v42 }
 0x31f   :  { %v342_v61 = vpop.f32.mrf.mxu2 }
 0x327   :  { %v343_v62 = vpop.f32.mrf.mxu2 }
 0x362   :  { %v458_v2 = vpop.f32.mrf.mxu2  ;;  %v473_v3 = vpop.f32.mrf.mxu3 }
 0x363   :  { %v462_v4 = vadd.f32 %v458_v2, %v1014_v35  ;;  %v477_v5 = vadd.f32 %v473_v3, %v463_v63 }
 0x365   :  { %479 = vst [vmem:[#allocation5 + $0x38] sm:$0xff] %v462_v4  ;;  %v482_v6 = vpack.c.bf16 %v477_v5, %v477_v5 }
 0x366   :  { %481 = vst [vmem:[#allocation5 + $0x40] sm:$0xff] %v477_v5 }
 0x367   :  { %491 = vmatmul.bf16.vlgmr.msra.gmra.mxu1 %v482_v6  ;;  %506 = vmatmul.bf16.vlgmr.msra.gmra.mxu0 %v482_v6 }
 0x36a   :  { %v460_v14 = vpop.f32.mrf.mxu2  ;;  %v475_v15 = vpop.f32.mrf.mxu3 }
 0x3e4   :  { %v492_v17 = vpop.f32.mrf.mxu1  ;;  %v507_v18 = vpop.f32.mrf.mxu0 }
 0x3e5   :  { %v496_v20 = vadd.f32 %v492_v17, %v281_v37  ;;  %v511_v21 = vadd.f32 %v507_v18, %v497_v16 }
 0x3e7   :  { %513 = vst [vmem:[#allocation5 + $0x48] sm:$0xff] %v496_v20  ;;  %v516_v23 = vpack.c.bf16 %v511_v21, %v511_v21 }
 0x3e8   :  { %515 = vst [vmem:[#allocation5 + $0x50] sm:$0xff] %v511_v21 }
 0x3e9   :  { %525 = vmatmul.bf16.vlgmr.msra.gmra.mxu2 %v516_v23  ;;  %540 = vmatmul.bf16.vlgmr.msrb.gmra.mxu3 %v516_v23 }
 0x3ec   :  { %v494_v24 = vpop.f32.mrf.mxu1  ;;  %v509_v26 = vpop.f32.mrf.mxu0 }
 0x46c   :  { %v526_v29 = vpop.f32.mrf.mxu2  ;;  %v541_v30 = vpop.f32.mrf.mxu3 }
 0x46d   :  { %v530_v31 = vadd.f32 %v526_v29, %v1031_v38  ;;  %v545_v32 = vadd.f32 %v541_v30, %v531_v27 }
 0x46f   :  { %547 = vst [vmem:[#allocation5 + $0x58] sm:$0xff] %v530_v31  ;;  %v550_v33 = vpack.c.bf16 %v545_v32, %v545_v32 }
 0x470   :  { %549 = vst [vmem:[#allocation5 + $0x60] sm:$0xff] %v545_v32 }
 0x471   :  { %559 = vmatmul.bf16.vlgmr.msrb.gmra.mxu1 %v550_v33  ;;  %574 = vmatmul.bf16.vlgmr.msrb.gmra.mxu0 %v550_v33 }
 0x474   :  { %v528_v34 = vpop.f32.mrf.mxu2  ;;  %v543_v35 = vpop.f32.mrf.mxu3 }
 0x4ee   :  { %v560_v0 = vpop.f32.mrf.mxu1  ;;  %v575_v1 = vpop.f32.mrf.mxu0 }
 0x4ef   :  { %v564_v7 = vadd.f32 %v560_v0, %v1036_v19  ;;  %v579_v37 = vadd.f32 %v575_v1, %v565_v36 }
 0x4f1   :  { %581 = vst [vmem:[#allocation5 + $0x68] sm:$0xff] %v564_v7 }
 0x4f2   :  { %583 = vst [vmem:[#allocation5 + $0x70] sm:$0xff] %v579_v37 }
 0x4f3   :  { %596 = dma.vmem_to_hbm [thread:$0]  %s589_s26, 1920, %s591_s29, [#allocation4], %s754_s30, %s754_s30, %s755_s5  }
 0x4f6   :  { %v562_v8 = vpop.f32.mrf.mxu1  ;;  %v577_v9 = vpop.f32.mrf.mxu0 }
 0x4f7   :  { %748 = dma.done.wait [#allocation4], 1920  }
 0x4f8   :  { %749 = vsyncadd [#allocation4], 4294965376 }
 0x4f9   :  { %601 = vsyncpa [#allocation3], 1 }
 0x4fa   :  { %602 = vsyncpa [#allocation4], 1 }

</bundles_post_ra>
